<compile_context>
chip_gen: v5e
topology: v5e:2x2
jax: 0.10.0
libtpu: 0.0.40
codegen_flags: <defaults>
</compile_context>

<pallas_src>
from functools import partial

import jax
import jax.numpy as jnp
from jax.experimental import pallas as pl
from jax.experimental.pallas import tpu as pltpu

_MIB = 1024 * 1024


def _shortcut_kernel(x_ref, w_ref, b_ref, o_ref):
    # x_ref: (Cin, TS)   one batch element, TS flattened (ho, wo) positions (lanes)
    # w_ref: (Cout, Cin) 1x1 conv weight with the BN scale folded in
    # b_ref: (Cout, 1)   folded BN bias (f32)
    # o_ref: (Cout, TS)
    y = jnp.dot(w_ref[...], x_ref[...], preferred_element_type=jnp.float32)  # MXU
    o_ref[...] = (y + b_ref[...]).astype(o_ref.dtype)


def _device_vmem_bytes():
    try:
        return int(pltpu.get_tpu_info().vmem_capacity_bytes)
    except Exception:
        return 64 * _MIB  # conservative (v7x-sized) fallback


def _is_v5e():
    try:
        kind = jax.devices()[0].device_kind.lower()
        return ("v5 lite" in kind) or ("v5e" in kind) or ("v5litepod" in kind)
    except Exception:
        return False


def _round_up(x, m):
    return -(-x // m) * m


def _pick_ts(S, per_lane_bytes, fixed_bytes, vmem_budget, max_ts):
    """Pick the spatial (lane) tile width.

    Prefers TS == S (no masked remainder, max lane density, fewest grid steps);
    otherwise the largest multiple of 128 that fits the VMEM budget, preferring
    an exact divisor of S so the last block is not a masked partial store.
    """
    budget_lanes = max(128, (vmem_budget - fixed_bytes) // max(per_lane_bytes, 1))
    cap = budget_lanes if max_ts is None else min(budget_lanes, max_ts)
    if S <= cap:
        return S
    ts = max(128, (cap // 128) * 128)
    if S % ts == 0:
        return ts
    cand = ts - 128
    while cand >= max(128, ts // 2):
        if S % cand == 0:
            return cand
        cand -= 128
    return ts


@partial(jax.jit,
         static_argnames=("stride", "eps", "max_ts", "compute_dtype", "out_dtype"))
def _projection_shortcut(x_nchw, weight, gamma, beta, running_mean, running_var,
                         *, stride, eps=1e-5, max_ts=None, compute_dtype=None,
                         out_dtype=None):
    """y = BN(Conv1x1_stride(x)) in inference form, NCHW in / NCHW out."""
    N, Cin, H, W = x_nchw.shape
    Cout = weight.shape[0]

    # 1x1 strided conv == strided spatial subsample + per-pixel channel matmul.
    # The subsample is fused into the Pallas input DMA via allow_input_fusion
    # (we are under jit), so no extra HBM pass materializes x_s.
    x_s = x_nchw if stride == 1 else x_nchw[:, :, ::stride, ::stride]
    Ho, Wo = x_s.shape[2], x_s.shape[3]
    S = Ho * Wo

    # Fold BatchNorm (inference) into the conv: scale commutes into the weight,
    # only the per-channel bias remains for the kernel epilogue (done in f32).
    scale = gamma / jnp.sqrt(running_var + eps)                       # (Cout,)
    bias = (beta - running_mean * scale).astype(jnp.float32).reshape(Cout, 1)
    w = weight.reshape(Cout, Cin) * scale[:, None]                    # (Cout, Cin)

    if compute_dtype is None:
        compute_dtype = x_nchw.dtype
        # v5e: deep-stage f32 shortcuts become MXU-bound; bf16 keeps the fast
        # MXU path and halves HBM read traffic (epilogue/accumulation stay f32).
        if x_nchw.dtype == jnp.float32 and Cin >= 256 and _is_v5e():
            compute_dtype = jnp.bfloat16
    if out_dtype is None:
        out_dtype = x_nchw.dtype

    x_flat = x_s.reshape(N, Cin, S).astype(compute_dtype)   # contiguous reshape
    w = w.astype(compute_dtype)

    in_itemsize = jnp.dtype(compute_dtype).itemsize
    out_itemsize = jnp.dtype(out_dtype).itemsize

    # --- Tile selection, sized to the actual device VMEM --------------------
    device_vmem = _device_vmem_bytes()
    vmem_budget = device_vmem - 8 * _MIB          # headroom for compiler scratch

    cin_p = _round_up(Cin, 8)
    cout_p = _round_up(Cout, 8)
    per_lane = 2 * (cin_p * in_itemsize + cout_p * out_itemsize)   # dbl-buffered x+out
    fixed = (2 * cout_p * _round_up(Cin, 128) * in_itemsize        # weight (x2, conservative)
             + 2 * cout_p * 128 * 4)                               # lane-padded bias
    TS = _pick_ts(S, per_lane, fixed, vmem_budget, max_ts)

    n_spatial_blocks = pl.cdiv(S, TS)
    # v7x megacore: avoid a 1-step grid (one idle TensorCore) for batch-1 cases.
    if N * n_spatial_blocks < 2 and S >= 256:
        TS = min(TS, _round_up(-(-S // 2), 128))
        n_spatial_blocks = pl.cdiv(S, TS)
    grid = (N, n_spatial_blocks)

    ts_pad = _round_up(TS, 128)
    vmem_need = (2 * cin_p * ts_pad * in_itemsize       # x tiles (double buffered)
                 + 2 * cout_p * ts_pad * out_itemsize   # out tiles (double buffered)
                 + fixed)
    vmem_limit = None
    if vmem_need > 32 * _MIB:                 # above the default scoped limit
        vmem_limit = min(int(vmem_need * 3 // 2), vmem_budget)

    cost = pl.CostEstimate(
        flops=2 * N * S * Cin * Cout,
        transcendentals=0,
        bytes_accessed=(x_flat.size * in_itemsize + w.size * in_itemsize
                        + bias.size * 4 + N * Cout * S * out_itemsize))

    out = pl.pallas_call(
        _shortcut_kernel,
        out_shape=jax.ShapeDtypeStruct((N, Cout, S), out_dtype),
        grid_spec=pltpu.PrefetchScalarGridSpec(
            num_scalar_prefetch=0,
            grid=grid,
            in_specs=[
                pl.BlockSpec((None, Cin, TS), lambda n, j: (n, 0, j)),   # x
                # TODO(synk): pipeline_mode=pl.Buffered(1) would single-buffer the
                # constant-index weight/bias and free up to 8 MiB VMEM for
                # deep-stage shortcuts on v7x.
                pl.BlockSpec((Cout, Cin), lambda n, j: (0, 0)),          # folded weight
                pl.BlockSpec((Cout, 1), lambda n, j: (0, 0)),            # folded bias
            ],
            out_specs=pl.BlockSpec((None, Cout, TS), lambda n, j: (n, 0, j)),
        ),
        compiler_params=pltpu.CompilerParams(
            dimension_semantics=("parallel", "parallel"),
            vmem_limit_bytes=vmem_limit,
            # Let XLA fuse the stride>1 spatial slice (and the tiny BN-fold math)
            # into the Pallas call's inputs instead of a separate HBM pass.
            allow_input_fusion=[True, True, True]),
        cost_estimate=cost,
    )(x_flat, w, bias)

    return out.reshape(N, Cout, Ho, Wo)       # contiguous reshape: no data movement


class ShortCutPallas:
    """JAX/Pallas port of models/resnet.py::ShortCut (inference-form BN)."""

    def __init__(self, in_channels, out_channels, stride, expansion, key,
                 compute_dtype=None, out_dtype=None):
        self.stride = stride
        self.in_channels = in_channels
        self.cout = out_channels * expansion
        self.compute_dtype = compute_dtype
        self.out_dtype = out_dtype
        self.has_projection = (stride != 1) or (in_channels != self.cout)
        if self.has_projection:
            kw, kg, kb, km, kv = jax.random.split(key, 5)
            # Conv2d(in, out*exp, kernel_size=1, stride=stride, bias=False)
            self.weight = jax.random.normal(
                kw, (self.cout, in_channels, 1, 1), jnp.float32) * 0.1
            # BatchNorm2d(out*exp) — deterministic synthetic params (inference form).
            self.gamma = 1.0 + 0.01 * jax.random.normal(kg, (self.cout,), jnp.float32)
            self.beta = 0.01 * jax.random.normal(kb, (self.cout,), jnp.float32)
            self.running_mean = 0.01 * jax.random.normal(km, (self.cout,), jnp.float32)
            self.running_var = jnp.abs(
                1.0 + 0.01 * jax.random.normal(kv, (self.cout,), jnp.float32))

    def __call__(self, x_nchw):
        if not self.has_projection:
            return x_nchw  # nn.Sequential() identity branch
        return _projection_shortcut(
            x_nchw, self.weight, self.gamma, self.beta,
            self.running_mean, self.running_var, stride=self.stride,
            compute_dtype=self.compute_dtype, out_dtype=self.out_dtype)


def _reference(x_nchw, mod: ShortCutPallas, eps=1e-5):
    """Pure-JAX reference (lax conv + BN) for correctness check."""
    if not mod.has_projection:
        return x_nchw
    y = jax.lax.conv_general_dilated(
        x_nchw, mod.weight, window_strides=(mod.stride, mod.stride),
        padding="VALID", dimension_numbers=("NCHW", "OIHW", "NCHW"))
    scale = mod.gamma / jnp.sqrt(mod.running_var + eps)
    bias = mod.beta - mod.running_mean * scale
    return y * scale[None, :, None, None] + bias[None, :, None, None]


if __name__ == "__main__":
    key = jax.random.PRNGKey(0)
    k_x, k_p, k_x2 = jax.random.split(key, 3)

    # 1) Projection branch: stride=2, Cin=4 -> Cout=8 (strided slice fused into DMA).
    N, Cin, H, W = 2, 4, 16, 16
    x = jax.random.normal(k_x, (N, Cin, H, W), jnp.float32)
    mod = ShortCutPallas(in_channels=Cin, out_channels=8, stride=2,
                         expansion=1, key=k_p)
    out = jax.block_until_ready(mod(x))
    ref = _reference(x, mod)
    assert out.shape == ref.shape == (N, 8, H // 2, W // 2), out.shape
    assert jnp.allclose(out, ref, atol=1e-4, rtol=1e-4), "stride-2 mismatch"

    # 2) stride=1 projection with forced tiling (max_ts=128) so S=144 exercises
    #    the masked partial last spatial block.
    x2 = jax.random.normal(k_x2, (N, Cin, 12, 12), jnp.float32)
    out2 = jax.block_until_ready(_projection_shortcut(
        x2, mod.weight, mod.gamma, mod.beta, mod.running_mean, mod.running_var,
        stride=1, max_ts=128))
    ref2 = jax.lax.conv_general_dilated(
        x2, mod.weight, window_strides=(1, 1), padding="VALID",
        dimension_numbers=("NCHW", "OIHW", "NCHW"))
    scale = mod.gamma / jnp.sqrt(mod.running_var + 1e-5)
    bias = mod.beta - mod.running_mean * scale
    ref2 = ref2 * scale[None, :, None, None] + bias[None, :, None, None]
    assert jnp.allclose(out2, ref2, atol=1e-4, rtol=1e-4), "partial-block mismatch"

    # 3) bf16 compute path (f32 accumulation + f32 epilogue).
    out_bf16c = jax.block_until_ready(
        ShortCutPallas(Cin, 8, 2, 1, key=k_p, compute_dtype=jnp.bfloat16)(x))
    assert jnp.allclose(out_bf16c, ref, atol=5e-2, rtol=5e-2), "bf16-compute mismatch"

    # 4) bf16 compute + bf16 output (halves the dominant output HBM traffic).
    mod_bf16 = ShortCutPallas(Cin, 8, 2, 1, key=k_p,
                              compute_dtype=jnp.bfloat16, out_dtype=jnp.bfloat16)
    out_bf16o = jax.block_until_ready(mod_bf16(x))
    assert out_bf16o.dtype == jnp.bfloat16
    assert jnp.allclose(out_bf16o.astype(jnp.float32), ref,
                        atol=5e-2, rtol=5e-2), "bf16-output mismatch"

    # 5) Identity branch (stride=1, in_channels == out_channels*expansion).
    mod_id = ShortCutPallas(in_channels=Cin, out_channels=Cin, stride=1,
                            expansion=1, key=k_p)
    assert jnp.array_equal(jax.block_until_ready(mod_id(x)), x)

    print("KERNEL_OK")
</pallas_src>

<mosaic_0001>
module attributes {stable_mosaic.version = 11 : i64} {
  func.func @_shortcut_kernel(%arg0: i32, %arg1: i32, %arg2: memref<1x4x64xf32, #tpu.memory_space<vmem>>, %arg3: memref<8x4xf32, #tpu.memory_space<vmem>>, %arg4: memref<8x1xf32, #tpu.memory_space<vmem>>, %arg5: memref<1x8x64xf32, #tpu.memory_space<vmem>>) attributes {dimension_semantics = [#tpu.dimension_semantics<parallel>, #tpu.dimension_semantics<parallel>], iteration_bounds = array<i64: 2, 1>, scalar_prefetch = 0 : i64, scratch_operands = 0 : i64, tpu.core_type = #tpu.core_type<tc>, window_params = [{transform_indices = @transform_0, window_bounds = array<i64: 1, 4, 64>}, {pipeline_mode = #tpu.pipeline_mode<synchronous>, transform_indices = @transform_1, window_bounds = array<i64: 8, 4>}, {pipeline_mode = #tpu.pipeline_mode<synchronous>, transform_indices = @transform_2, window_bounds = array<i64: 8, 1>}, {transform_indices = @transform_3, window_bounds = array<i64: 1, 8, 64>}]} {
    %c0 = arith.constant 0 : index
    %c0_0 = arith.constant 0 : index
    %0 = vector.load %arg3[%c0, %c0_0] : memref<8x4xf32, #tpu.memory_space<vmem>>, vector<8x4xf32>
    %c0_1 = arith.constant 0 : index
    %c0_2 = arith.constant 0 : index
    %c0_3 = arith.constant 0 : index
    %1 = vector.load %arg2[%c0_1, %c0_2, %c0_3] : memref<1x4x64xf32, #tpu.memory_space<vmem>>, vector<1x4x64xf32>
    %2 = vector.shape_cast %1 : vector<1x4x64xf32> to vector<4x64xf32>
    %cst = arith.constant dense<0.000000e+00> : vector<8x64xf32>
    %3 = tpu.matmul %0, %2, %cst {dimension_numbers = #tpu.dot_dimension_numbers<[1], [0], [0], [1], [0, 0, 1, 1], [], []>} : vector<8x4xf32>, vector<4x64xf32>, vector<8x64xf32> -> vector<8x64xf32>
    %c0_4 = arith.constant 0 : index
    %c0_5 = arith.constant 0 : index
    %4 = vector.load %arg4[%c0_4, %c0_5] : memref<8x1xf32, #tpu.memory_space<vmem>>, vector<8x1xf32>
    %5 = vector.broadcast %4 : vector<8x1xf32> to vector<8x64xf32>
    %6 = arith.addf %3, %5 : vector<8x64xf32>
    %c0_6 = arith.constant 0 : index
    %c0_7 = arith.constant 0 : index
    %c0_8 = arith.constant 0 : index
    %7 = vector.load %arg5[%c0_6, %c0_7, %c0_8] : memref<1x8x64xf32, #tpu.memory_space<vmem>>, vector<1x8x64xf32>
    %8 = vector.shape_cast %7 : vector<1x8x64xf32> to vector<8x64xf32>
    %9 = vector.shape_cast %6 : vector<8x64xf32> to vector<1x8x64xf32>
    tpu.vector_store %arg5[%c0_6, %c0_7, %c0_8], %9 {strides = array<i32>} : memref<1x8x64xf32, #tpu.memory_space<vmem>>, vector<1x8x64xf32>,
    return
  }
  func.func @transform_0(%arg0: i32, %arg1: i32) -> (i32, i32, i32) {
    %c0_i32 = arith.constant 0 : i32
    %c0_i32_0 = arith.constant 0 : i32
    return %arg0, %c0_i32, %arg1 : i32, i32, i32
  }
  func.func @transform_1(%arg0: i32, %arg1: i32) -> (i32, i32) {
    %c0_i32 = arith.constant 0 : i32
    %c0_i32_0 = arith.constant 0 : i32
    %c0_i32_1 = arith.constant 0 : i32
    return %c0_i32, %c0_i32_0 : i32, i32
  }
  func.func @transform_2(%arg0: i32, %arg1: i32) -> (i32, i32) {
    %c0_i32 = arith.constant 0 : i32
    %c0_i32_0 = arith.constant 0 : i32
    %c0_i32_1 = arith.constant 0 : i32
    return %c0_i32, %c0_i32_0 : i32, i32
  }
  func.func @transform_3(%arg0: i32, %arg1: i32) -> (i32, i32, i32) {
    %c0_i32 = arith.constant 0 : i32
    %c0_i32_0 = arith.constant 0 : i32
    return %arg0, %c0_i32, %arg1 : i32, i32, i32
  }
}

</mosaic_0001>

<bundles_post_ra>
// kernel: _projection_shortcut.2
= control target key start
LH: loop header
LB: loop body
LE: loop exit
PB: predicated region body
PF: predicated region fallthrough
CT: control target
= control target key end

     0   :  { %s439_s15 = smov 0   ;;  %s441_s16 = smov 0   ;;  %s481_s0 = inlined_call_operand.vmem [shape: f32[2,4,64], index: 0, kind: input, shape index: {}]   ;;  %s482_s1 = inlined_call_operand.vmem [shape: f32[8,1], index: 1, kind: input, shape index: {}]   ;;  %s483_s2 = inlined_call_operand.vmem [shape: f32[8,4], index: 2, kind: input, shape index: {}]   ;;  %s484_s3 = inlined_call_operand.vmem [shape: f32[8], index: 3, kind: input, shape index: {}]   ;;  %s485_s4 = inlined_call_operand.vmem [shape: f32[2,8,64], index: 4, kind: output, shape index: {}]  }
   0x1   :  { %s443_s17 = smov 0  }
   0x2 LB: > { %s26_s18 = sadd.s32 1, %s407_s16  ;;  %p355_p0 = scmp.ge.s32.totalorder %s411_s17, 1  ;;  %s411_s17 = sphi %s443_s17, %s14_s17   ;;  %s407_s16 = sphi %s441_s16, %s487_s16   ;;  %s403_s15 = sphi %s439_s15, %s486_s15  }
   0x3   : > { %p28_p1 = scmp.ge.s32.totalorder %s26_s18, 2  ;;  %p180_p2 = scmp.lt.s32.totalorder %s411_s17, 3 }
   0x5   : > { %s489_s18 = smov (%p28_p1, %s26_s18), 0  ;;  %p181_p3 = pnand %p355_p0, %p180_p2 }
   0x6   : > { %p210_p4 = scmp.lt.s32.totalorder (!%p181_p3), %s403_s15, 1 }
   0x7   : > { %184 = sbr.rel (%p181_p3) target bundleno = 270 (0x10e), region = 36 }
   0xc   : > { %v226_v0 = vlaneseq  ;;  %v225_v2 = vld [vmem:[%s484_s3] ss:$0 sm:$0xff]  ;;  %s491_s15 = smov (!%p210_p4, %s403_s15), 1  ;;  %vm251_vm0 = vcmask 1043456   ;;  %v413_v5 = vmov 0   ;;  %vm247_vm1 = vcmask 31744  }
   0xd   : > { %s356_s21 = sshll.u32 %s491_s15, 2  ;;  %v241_v4 = vld [vmem:[%s482_s1] sm:$0xff]  ;;  %s357_s29 = sshll.u32 %s491_s15, 3  ;;  %vm275_vm2 = vcmask 523264  }
   0xe   : > { %v227_v1 = vshrl.u32 %v226_v0, 7  ;;  %s216_s24 = scalar_lea.vmem %s481_s0, %s356_s21  ;;  %v224_v6 = vld [vmem:[%s483_s2] sm:$0xff]  ;;  %s223_s6 = scalar_lea.vmem %s485_s4, %s357_s29 }
   0xf   : > { %v240_v3 = vld [vmem:[%s216_s24] sm:$0xf] }
  0x10   : > { %387 = vset.pattern.permute.xlu0 %v227_v1  ;;  %358 = vmatpush.msk.msra.mxu0 %vm251_vm0, %v240_v3 }
  0x18   : > { %230 = vperm.xlu0 %387, %v225_v2  }
  0x20   : > { %388 = vset.pattern.permute.xlu0 %v413_v5 }
  0x21   : > { %244 = vperm.xlu0 %388, %v241_v4  }
  0x8a   : > { %v231_v7 = vpop.permute.xlu0 %230 }
  0x8b   : > { %v234_v8 = vmul.f32 %v231_v7, %v224_v6 }
  0x8d   : > { %359 = vmatmul.msk.f32.vlgmr.msra.gmra.mxu0 %vm247_vm1, %v234_v8 }
  0x93   : > { %v245_v9 = vpop.permute.xlu0 %244 }
 0x10a   : > { %v272_v10 = vpop.f32.mrf.mxu0 }
 0x10b   : > { %v273_v11 = vadd.f32 %v272_v10, %v245_v9 }
 0x10d   : > { %276 = vst.msk [vmem:[%s223_s6] sm:$0xff] %vm275_vm2, %v273_v11 }
 0x10e PF: > { %s14_s17 = sadd.s32 1, %s411_s17   ;;  %s486_s15 = smov %s407_s16 }
 0x10f   : > { %p11_p5 = scmp.ge.s32.totalorder %s14_s17, 4   ;;  %s487_s16 = smov %s489_s18 }
 0x111   :  { %13 = sbr.rel (!%p11_p5) target bundleno = 2 (0x2), region = 66 }

</bundles_post_ra>
